<compile_context>
chip_gen: v7x
topology: tpu7x:2x2x1
jax: 0.10.0
libtpu: 0.0.40
codegen_flags: <defaults>
</compile_context>

<pallas_src>
import functools

import jax
import jax.numpy as jnp
from jax.experimental import pallas as pl
from jax.experimental.pallas import tpu as pltpu

BN_EPS = 1e-5
LANE = 128
_VMEM_LIMIT_BYTES = 48 * 1024 * 1024   # < 64 MiB (v7x); ample headroom v5e/v6e
_TILE_BUDGET_BYTES = 36 * 1024 * 1024  # streamed-tile budget inside that limit
_TM_CAP = 2048


# ------------------------------ kernel helpers ------------------------------

def _linear_relu(x, w_ref, b_ref):
    """relu(x @ W + b) with bf16 MXU operands and f32 accumulation."""
    return jnp.maximum(
        jnp.dot(x.astype(jnp.bfloat16), w_ref[...],
                preferred_element_type=jnp.float32) + b_ref[...],
        0.0)


def _write_partial_stats(sum_ref, sq_ref, h, tm, n_total):
    """Emit this tile's (sum, sum-of-squares) over valid rows only.

    The validity mask (two (tm, C) selects) is only materialized for the
    possibly-partial last tile; full tiles take the unmasked path.
    """
    i = pl.program_id(0)
    n_tiles = pl.num_programs(0)

    def _emit(hv):
        sum_ref[...] = jnp.sum(hv, axis=0, keepdims=True)[None]
        sq_ref[...] = jnp.sum(hv * hv, axis=0, keepdims=True)[None]

    if n_total % tm == 0:          # static: no ragged tile exists
        _emit(h)
    else:
        @pl.when(i < n_tiles - 1)
        def _full():
            _emit(h)

        @pl.when(i == n_tiles - 1)
        def _partial():
            rows_left = n_total - i * tm
            valid = jax.lax.broadcasted_iota(jnp.int32, (tm, 1), 0) < rows_left
            _emit(jnp.where(valid, h, 0.0))


# --------------------------------- kernels ----------------------------------

def _pass1_kernel(x_ref, w1_ref, b1_ref, sum_ref, sq_ref, *, tm, n_total):
    """Layer 1 + ReLU; BN1 partial stats.  (dim <= h1: h1 is NOT materialized.)"""
    h1 = _linear_relu(x_ref[...], w1_ref, b1_ref)
    _write_partial_stats(sum_ref, sq_ref, h1, tm, n_total)


def _pass1_mat_kernel(x_ref, w1_ref, b1_ref, h1_ref, sum_ref, sq_ref, *,
                      tm, n_total):
    """Layer 1 + ReLU; materialize h1 (bf16) so x is streamed exactly once."""
    h1 = _linear_relu(x_ref[...], w1_ref, b1_ref)
    h1_ref[...] = h1.astype(jnp.bfloat16)
    _write_partial_stats(sum_ref, sq_ref, h1, tm, n_total)


def _pass2_from_x_kernel(x_ref, w1_ref, b1_ref, s1_ref, t1_ref, w2_ref, b2_ref,
                         h2_ref, sum_ref, sq_ref, *, tm, n_total):
    """Recompute layer 1, apply BN1, layer 2 + ReLU; materialize h2 + stats."""
    h1 = _linear_relu(x_ref[...], w1_ref, b1_ref)
    h2 = _linear_relu(h1 * s1_ref[...] + t1_ref[...], w2_ref, b2_ref)
    h2_ref[...] = h2.astype(jnp.bfloat16)
    _write_partial_stats(sum_ref, sq_ref, h2, tm, n_total)


def _pass2_from_h1_kernel(h1_ref, s1_ref, t1_ref, w2_ref, b2_ref,
                          h2_ref, sum_ref, sq_ref, *, tm, n_total):
    """Apply BN1 to materialized h1, layer 2 + ReLU; materialize h2 + stats."""
    n1 = h1_ref[...].astype(jnp.float32) * s1_ref[...] + t1_ref[...]
    h2 = _linear_relu(n1, w2_ref, b2_ref)
    h2_ref[...] = h2.astype(jnp.bfloat16)
    _write_partial_stats(sum_ref, sq_ref, h2, tm, n_total)


def _pass3_kernel(h2_ref, s2_ref, t2_ref, w3_ref, b3_ref, o_ref):
    """Apply BN2, final Linear, emit the lane-dense (128-padded) output tile."""
    n2 = h2_ref[...].astype(jnp.float32) * s2_ref[...] + t2_ref[...]
    o_ref[...] = (jnp.dot(n2.astype(jnp.bfloat16), w3_ref[...],
                          preferred_element_type=jnp.float32) + b3_ref[...])


# ------------------------------ wrapper pieces -------------------------------

def _bn_fold(sums, sqs, n, gamma, beta):
    """Fold per-tile partial sums into fused BN scale/shift (tiny XLA op)."""
    s = jnp.sum(sums[:, 0, :], axis=0)
    ss = jnp.sum(sqs[:, 0, :], axis=0)
    mu = s / n
    var = ss / n - mu * mu
    # TODO(synk): E[x^2]-E[x]^2 in f32 can cancel for very large N (real pixel
    # counts are H*W); use a compensated / two-pass accumulation if tighter BN
    # parity with the f32 torch module is required.
    scale = gamma * jax.lax.rsqrt(var + BN_EPS)      # (1, C)
    shift = beta - mu * scale                        # (1, C)
    return scale, shift


def _pick_tile(n, dim, h1, h2, padc, tm_max=None):
    """Largest row tile that keeps double-buffered streamed tiles in budget."""
    per_row = max(
        dim * 4 * 2 + h1 * 4 + h1 * 2 * 2,                # pass 1 (f32 x in)
        max(dim * 4, h1 * 2) * 2 + h1 * 4 + h2 * 2 * 2,   # pass 2
        h2 * 2 * 2 + padc * 4 * 3,                        # pass 3 (padded out)
    )
    tm = max(16, _TILE_BUDGET_BYTES // per_row)
    tm = min(tm, _TM_CAP, n)
    if tm_max is not None:
        tm = min(tm, tm_max)
    if tm < n:  # partial tiles need sublane / bf16-packing alignment
        tm = (tm // 256) * 256 if tm >= 256 else max(16, (tm // 16) * 16)
    return int(tm)


def pixel_classifier_forward(x, params, tm_max=None):
    """x: [N, dim] float32.  params: dict of weights (see init_params)."""
    n, dim = x.shape
    h1 = params["w1"].shape[1]
    h2 = params["w2"].shape[1]
    num_class = params["w3"].shape[1]
    padc = -(-num_class // LANE) * LANE          # lane-dense output width

    w1 = params["w1"].astype(jnp.bfloat16)
    w2 = params["w2"].astype(jnp.bfloat16)
    w3 = params["w3"].astype(jnp.bfloat16)
    b1, g1, be1 = params["b1"], params["g1"], params["be1"]
    b2, g2, be2 = params["b2"], params["g2"], params["be2"]
    b3 = params["b3"]
    if padc != num_class:                        # zero-pad tiny layer-3 params
        w3 = jnp.pad(w3, ((0, 0), (0, padc - num_class)))
        b3 = jnp.pad(b3, ((0, 0), (0, padc - num_class)))

    tm = _pick_tile(n, dim, h1, h2, padc, tm_max)
    n_tiles = pl.cdiv(n, tm)
    grid = (n_tiles,)
    materialize_h1 = dim > h1   # stream whichever of x / h1 is narrower

    cparams = pltpu.CompilerParams(
        dimension_semantics=("parallel",),       # independent row tiles ->
        vmem_limit_bytes=_VMEM_LIMIT_BYTES)      # megacore-shardable on v7x

    def row_spec(cols):
        return pl.BlockSpec((tm, cols), lambda i: (i, 0))

    def stats_spec(cols):
        return pl.BlockSpec((1, 1, cols), lambda i: (i, 0, 0))

    def stats_shape(cols):
        return jax.ShapeDtypeStruct((n_tiles, 1, cols), jnp.float32)

    def resident(a):
        # Constant block index -> params stay resident across grid steps.
        return pl.BlockSpec(a.shape, lambda i, _nd=a.ndim: (0,) * _nd)

    # ---- pass 1: layer 1 + BN1 partial stats (optionally materialize h1) ----
    if materialize_h1:
        h1_bf, sums1, sqs1 = pl.pallas_call(
            functools.partial(_pass1_mat_kernel, tm=tm, n_total=n),
            grid=grid,
            in_specs=[row_spec(dim), resident(w1), resident(b1)],
            out_specs=(row_spec(h1), stats_spec(h1), stats_spec(h1)),
            out_shape=(jax.ShapeDtypeStruct((n, h1), jnp.bfloat16),
                       stats_shape(h1), stats_shape(h1)),
            compiler_params=cparams,
        )(x, w1, b1)
    else:
        sums1, sqs1 = pl.pallas_call(
            functools.partial(_pass1_kernel, tm=tm, n_total=n),
            grid=grid,
            in_specs=[row_spec(dim), resident(w1), resident(b1)],
            out_specs=(stats_spec(h1), stats_spec(h1)),
            out_shape=(stats_shape(h1), stats_shape(h1)),
            compiler_params=cparams,
        )(x, w1, b1)
    s1, t1 = _bn_fold(sums1, sqs1, n, g1, be1)

    # ---- pass 2: BN1 + layer 2 + BN2 partial stats; materialize h2 (bf16) ----
    h2_specs = (row_spec(h2), stats_spec(h2), stats_spec(h2))
    h2_shapes = (jax.ShapeDtypeStruct((n, h2), jnp.bfloat16),
                 stats_shape(h2), stats_shape(h2))
    if materialize_h1:
        h2_bf, sums2, sqs2 = pl.pallas_call(
            functools.partial(_pass2_from_h1_kernel, tm=tm, n_total=n),
            grid=grid,
            in_specs=[row_spec(h1), resident(s1), resident(t1),
                      resident(w2), resident(b2)],
            out_specs=h2_specs, out_shape=h2_shapes,
            compiler_params=cparams,
        )(h1_bf, s1, t1, w2, b2)
    else:
        h2_bf, sums2, sqs2 = pl.pallas_call(
            functools.partial(_pass2_from_x_kernel, tm=tm, n_total=n),
            grid=grid,
            in_specs=[row_spec(dim), resident(w1), resident(b1),
                      resident(s1), resident(t1), resident(w2), resident(b2)],
            out_specs=h2_specs, out_shape=h2_shapes,
            compiler_params=cparams,
        )(x, w1, b1, s1, t1, w2, b2)
    s2, t2 = _bn_fold(sums2, sqs2, n, g2, be2)

    # ---- pass 3: BN2 + layer 3; the ONLY pass that writes the output ----
    out_pad = pl.pallas_call(
        _pass3_kernel,
        grid=grid,
        in_specs=[row_spec(h2), resident(s2), resident(t2),
                  resident(w3), resident(b3)],
        out_specs=row_spec(padc),
        out_shape=jax.ShapeDtypeStruct((n, padc), jnp.float32),
        compiler_params=cparams,
    )(h2_bf, s2, t2, w3, b3)

    return out_pad[:, :num_class] if padc != num_class else out_pad


# ------------------------- params / pure-JAX reference -----------------------

def init_params(key, dim, numpy_class, gain=0.02):
    """Synthetic params mirroring pixel_classifier.init_weights('normal'):
    Linear weights ~ N(0, gain), biases 0; BatchNorm affine at defaults."""
    if numpy_class < 32:
        h1, h2 = 128, 32
    else:
        h1, h2 = 256, 128

    k1, k2, k3 = jax.random.split(key, 3)
    f32 = jnp.float32
    return {
        # stored as [in, out] (transposed relative to torch's [out, in])
        "w1": gain * jax.random.normal(k1, (dim, h1), f32),
        "b1": jnp.zeros((1, h1), f32),
        "g1": jnp.ones((1, h1), f32),
        "be1": jnp.zeros((1, h1), f32),
        "w2": gain * jax.random.normal(k2, (h1, h2), f32),
        "b2": jnp.zeros((1, h2), f32),
        "g2": jnp.ones((1, h2), f32),
        "be2": jnp.zeros((1, h2), f32),
        "w3": gain * jax.random.normal(k3, (h2, numpy_class), f32),
        "b3": jnp.zeros((1, numpy_class), f32),
    }


def _batchnorm_train(h, gamma, beta):
    mu = jnp.mean(h, axis=0, keepdims=True)
    var = jnp.mean((h - mu) * (h - mu), axis=0, keepdims=True)
    return (h - mu) * jax.lax.rsqrt(var + BN_EPS) * gamma + beta


def reference_forward(x, params):
    """Pure-JAX f32 reference (exact module semantics) for validation."""
    h1 = jnp.maximum(x @ params["w1"] + params["b1"], 0.0)
    h1 = _batchnorm_train(h1, params["g1"], params["be1"])
    h2 = jnp.maximum(h1 @ params["w2"] + params["b2"], 0.0)
    h2 = _batchnorm_train(h2, params["g2"], params["be2"])
    return h2 @ params["w3"] + params["b3"]


if __name__ == "__main__":
    key = jax.random.PRNGKey(0)
    kx, kp, kx2 = jax.random.split(key, 3)

    # numpy_class < 32 branch -> hidden sizes 128 and 32.
    N, DIM, NUM_CLASS = 1024, 64, 10
    x = jax.random.normal(kx, (N, DIM), jnp.float32)
    params = init_params(kp, DIM, NUM_CLASS)

    # 1) dim <= h1 path (x streamed twice, h2 materialized); 4 full row tiles.
    out = jax.block_until_ready(pixel_classifier_forward(x, params, tm_max=256))
    ref = reference_forward(x, params)
    assert out.shape == (N, NUM_CLASS)
    # bf16 matmul operands vs f32 reference -> loosened tolerance.
    assert jnp.allclose(out, ref, atol=5e-2, rtol=5e-2), \
        float(jnp.max(jnp.abs(out - ref)))

    # 2) Ragged batch -> exercises the partial-last-tile stats masking.
    xr = x[:1000]
    outr = jax.block_until_ready(pixel_classifier_forward(xr, params, tm_max=256))
    refr = reference_forward(xr, params)
    assert jnp.allclose(outr, refr, atol=5e-2, rtol=5e-2), \
        float(jnp.max(jnp.abs(outr - refr)))

    # 3) dim > h1 path (h1 materialized, x streamed exactly once).
    N2, DIM2 = 512, 192
    x2 = jax.random.normal(kx2, (N2, DIM2), jnp.float32)
    params2 = init_params(jax.random.PRNGKey(1), DIM2, NUM_CLASS)
    out2 = jax.block_until_ready(pixel_classifier_forward(x2, params2, tm_max=128))
    ref2 = reference_forward(x2, params2)
    assert jnp.allclose(out2, ref2, atol=5e-2, rtol=5e-2), \
        float(jnp.max(jnp.abs(out2 - ref2)))

    print("KERNEL_OK")
</pallas_src>

<mosaic_0001>
module attributes {stable_mosaic.version = 11 : i64} {
  func.func @_pass1_kernel(%arg0: i32, %arg1: memref<256x64xf32, #tpu.memory_space<vmem>>, %arg2: memref<64x128xbf16, #tpu.memory_space<vmem>>, %arg3: memref<1x128xf32, #tpu.memory_space<vmem>>, %arg4: memref<1x1x128xf32, #tpu.memory_space<vmem>>, %arg5: memref<1x1x128xf32, #tpu.memory_space<vmem>>) attributes {dimension_semantics = [#tpu.dimension_semantics<parallel>], iteration_bounds = array<i64: 4>, scalar_prefetch = 0 : i64, scratch_operands = 0 : i64, tpu.core_type = #tpu.core_type<tc>, window_params = [{transform_indices = @transform_0, window_bounds = array<i64: 256, 64>}, {pipeline_mode = #tpu.pipeline_mode<synchronous>, transform_indices = @transform_1, window_bounds = array<i64: 64, 128>}, {pipeline_mode = #tpu.pipeline_mode<synchronous>, transform_indices = @transform_2, window_bounds = array<i64: 1, 128>}, {transform_indices = @transform_3, window_bounds = array<i64: 1, 1, 128>}, {transform_indices = @transform_4, window_bounds = array<i64: 1, 1, 128>}]} {
    %c0 = arith.constant 0 : index
    %c0_0 = arith.constant 0 : index
    %0 = vector.load %arg1[%c0, %c0_0] : memref<256x64xf32, #tpu.memory_space<vmem>>, vector<256x64xf32>
    %1 = arith.truncf %0 : vector<256x64xf32> to vector<256x64xbf16>
    %c0_1 = arith.constant 0 : index
    %c0_2 = arith.constant 0 : index
    %2 = vector.load %arg2[%c0_1, %c0_2] : memref<64x128xbf16, #tpu.memory_space<vmem>>, vector<64x128xbf16>
    %cst = arith.constant dense<0.000000e+00> : vector<256x128xf32>
    %3 = tpu.matmul %1, %2, %cst {dimension_numbers = #tpu.dot_dimension_numbers<[1], [0], [0], [1], [0, 0, 1, 1], [], []>} : vector<256x64xbf16>, vector<64x128xbf16>, vector<256x128xf32> -> vector<256x128xf32>
    %c0_3 = arith.constant 0 : index
    %c0_4 = arith.constant 0 : index
    %4 = vector.load %arg3[%c0_3, %c0_4] : memref<1x128xf32, #tpu.memory_space<vmem>>, vector<1x128xf32>
    %5 = vector.broadcast %4 : vector<1x128xf32> to vector<256x128xf32>
    %6 = arith.addf %3, %5 : vector<256x128xf32>
    %cst_5 = arith.constant 0.000000e+00 : f32
    %7 = vector.broadcast %cst_5 : f32 to vector<256x128xf32>
    %8 = arith.maximumf %6, %7 : vector<256x128xf32>
    %cst_6 = arith.constant dense<0.000000e+00> : vector<128xf32>
    %9 = vector.multi_reduction <add>, %8, %cst_6 [0] : vector<256x128xf32> to vector<128xf32>
    %10 = vector.shape_cast %9 : vector<128xf32> to vector<1x128xf32>
    %11 = vector.shape_cast %10 : vector<1x128xf32> to vector<1x1x128xf32>
    %c0_7 = arith.constant 0 : index
    %c0_8 = arith.constant 0 : index
    %c0_9 = arith.constant 0 : index
    %12 = vector.load %arg4[%c0_7, %c0_8, %c0_9] : memref<1x1x128xf32, #tpu.memory_space<vmem>>, vector<1x1x128xf32>
    tpu.vector_store %arg4[%c0_7, %c0_8, %c0_9], %11 {strides = array<i32>} : memref<1x1x128xf32, #tpu.memory_space<vmem>>, vector<1x1x128xf32>,
    %13 = arith.mulf %8, %8 : vector<256x128xf32>
    %cst_10 = arith.constant dense<0.000000e+00> : vector<128xf32>
    %14 = vector.multi_reduction <add>, %13, %cst_10 [0] : vector<256x128xf32> to vector<128xf32>
    %15 = vector.shape_cast %14 : vector<128xf32> to vector<1x128xf32>
    %16 = vector.shape_cast %15 : vector<1x128xf32> to vector<1x1x128xf32>
    %c0_11 = arith.constant 0 : index
    %c0_12 = arith.constant 0 : index
    %c0_13 = arith.constant 0 : index
    %17 = vector.load %arg5[%c0_11, %c0_12, %c0_13] : memref<1x1x128xf32, #tpu.memory_space<vmem>>, vector<1x1x128xf32>
    tpu.vector_store %arg5[%c0_11, %c0_12, %c0_13], %16 {strides = array<i32>} : memref<1x1x128xf32, #tpu.memory_space<vmem>>, vector<1x1x128xf32>,
    return
  }
  func.func @transform_0(%arg0: i32) -> (i32, i32) {
    %c0_i32 = arith.constant 0 : i32
    %c0_i32_0 = arith.constant 0 : i32
    return %arg0, %c0_i32 : i32, i32
  }
  func.func @transform_1(%arg0: i32) -> (i32, i32) {
    %c0_i32 = arith.constant 0 : i32
    %c0_i32_0 = arith.constant 0 : i32
    %c0_i32_1 = arith.constant 0 : i32
    return %c0_i32, %c0_i32_0 : i32, i32
  }
  func.func @transform_2(%arg0: i32) -> (i32, i32) {
    %c0_i32 = arith.constant 0 : i32
    %c0_i32_0 = arith.constant 0 : i32
    %c0_i32_1 = arith.constant 0 : i32
    return %c0_i32, %c0_i32_0 : i32, i32
  }
  func.func @transform_3(%arg0: i32) -> (i32, i32, i32) {
    %c0_i32 = arith.constant 0 : i32
    %c0_i32_0 = arith.constant 0 : i32
    %c0_i32_1 = arith.constant 0 : i32
    return %arg0, %c0_i32, %c0_i32_0 : i32, i32, i32
  }
  func.func @transform_4(%arg0: i32) -> (i32, i32, i32) {
    %c0_i32 = arith.constant 0 : i32
    %c0_i32_0 = arith.constant 0 : i32
    %c0_i32_1 = arith.constant 0 : i32
    return %arg0, %c0_i32, %c0_i32_0 : i32, i32, i32
  }
}

</mosaic_0001>

<bundles_post_ra>
// kernel: tpu_custom_call.1
= control target key start
LH: loop header
LB: loop body
LE: loop exit
PB: predicated region body
PF: predicated region fallthrough
CT: control target
= control target key end

     0   :  { %10 = vsyncpa [#allocation3], 0  ;;  %s1312_s0 = inlined_call_operand.vmem [shape: f32[1024,64], index: 0, kind: input, shape index: {}]   ;;  %s1313_s1 = inlined_call_operand.vmem [shape: bf16[64,128], index: 1, kind: input, shape index: {}]   ;;  %s1314_s2 = inlined_call_operand.vmem [shape: f32[1,128], index: 2, kind: input, shape index: {}]   ;;  %s1315_s3 = inlined_call_operand.hbm [shape: f32[4,1,128], index: 3, kind: output, shape index: {0}]   ;;  %s1316_s4 = inlined_call_operand.hbm [shape: f32[4,1,128], index: 4, kind: output, shape index: {1}]  }
   0x1   :  { %12 = vsyncpa [#allocation3 + $0x1], 0 }
   0x2   :  { %13 = vsyncpa [#allocation5], 0 }
   0x3   :  { %15 = vsyncpa [#allocation5 + $0x1], 0  ;;  %s1028_s15 = smov 0   ;;  %s1030_s16 = smov 0  }
   0x4   :  { %s1032_s17 = smov 0   ;;  %s1034_s18 = smov 0  }
   0x5 LB: > { %s1049_s19 = sadd.s32 4294967295, %s999_s18   ;;  %s758_s20 = sadd.s32 4294967294, %s999_s18   ;;  %s999_s18 = sphi %s1034_s18, %s1322_s18   ;;  %s995_s17 = sphi %s1032_s17, %s1321_s17   ;;  %s991_s16 = sphi %s1030_s16, %s1320_s16   ;;  %s987_s15 = sphi %s1028_s15, %s1319_s15  }
   0x6   : > { %s1053_s21 = sadd.s32 1, %s999_s18   ;;  %s96_s22 = sadd.s32 1, %s995_s17 }
   0x7   : > { %s93_s23 = ssub.s32 %s999_s18, %s1053_s21  ;;  %p106_p0 = scmp.ne.s32.totalorder %s995_s17, %s991_s16 }
   0x8   : > { %p94_p1 = scmp.eq.s32.totalorder %s93_s23, 0  ;;  %p107_p2 = scmp.eq.s32.totalorder %s1049_s19, 3 }
   0x9   : > { %p112_p3 = scmp.ne.s32.totalorder %s991_s16, %s987_s15  ;;  %p113_p4 = scmp.eq.s32.totalorder %s758_s20, 3 }
   0xa   : > { %s1064_s24 = scalar_select %p94_p1, %s995_s17, %s96_s22  }
   0xb   : > { %p1066_p5 = por %p107_p2, %p106_p0  ;;  %p1070_p6 = por %p113_p4, %p112_p3 }
   0xc   : > { %p761_p7 = scmp.ge.s32.totalorder %s999_s18, 1  ;;  %p172_p8 = scmp.lt.s32.totalorder %s999_s18, 5 }
   0xe   : > { %p173_p9 = pnand %p761_p7, %p172_p8 }
   0xf   : > { %v901_v0 = vld [vmem:[%s1313_s1] sm:$0xff] (!%p173_p9)   ;;  %s762_s29 = sshll.u32 (!%p173_p9), %s1049_s19, 5  ;;  %v902_v1 = vld [vmem:[%s1313_s1 + $0x8] sm:$0xff] (!%p173_p9)   ;;  %v903_v2 = vld [vmem:[%s1313_s1 + $0x10] sm:$0xff] (!%p173_p9)   ;;  %vm295_vm0 = vcmask (!%p173_p9), 523264   ;;  %s1228_s22 = sand.u32 (!%p173_p9), 1, %s991_s16  }
  0x10   : > { %176 = sbr.rel (%p173_p9) target bundleno = 362 (0x16a), region = 32  ;;  %p202_p10 = scmp.lt.s32.totalorder (!%p173_p9), %s762_s29, 127  ;;  %809 = vmatprep.subr.bf16.mxu0 (!%p173_p9), %v901_v0  ;;  %849 = vmatprep.subr.bf16.mxu1 (!%p173_p9), %v901_v0  ;;  %v904_v5 = vld [vmem:[%s1313_s1 + $0x18] sm:$0xff] (!%p173_p9)   ;;  %v1145_v52 = vld [vmem:[%s1314_s2] ss:$0 sm:$0xff] (!%p173_p9) }
  0x11   : > { %810 = vmatpush3.bf16.msra.mxu0 (!%p173_p9), %v901_v0  ;;  %853 = vmatpush3.bf16.msra.mxu1 (!%p173_p9), %v901_v0  ;;  %s785_s23 = sshll.u32 (!%p173_p9), %s1049_s19, 4  ;;  %s194_s27 = scalar_lea.vmem (!%p173_p9), [#allocation2], %s1228_s22 }
  0x12   : > { %811 = vmatprep.subr.bf16.mxu0 (!%p173_p9), %v902_v1  ;;  %850 = vmatprep.subr.bf16.mxu1 (!%p173_p9), %v902_v1  ;;  %s662_s28 = sshll.u32 (!%p173_p9), %s194_s27, 4  ;;  %s1238_s7 = scalar_lea.hbm (!%p173_p9), %s1315_s3, %s785_s23  ;;  %s1240_s28 = int_to_ptr.vmem [resolvable:$true] %s662_s28 }
  0x13   : > { %s1245_s9 = scalar_lea.hbm (!%p173_p9), %s1316_s4, %s785_s23  ;;  %s646_s10 = scalar_lea.sflag (!%p173_p9), [#allocation3], %s1228_s22 }
  0x14   : > { %s1001_s12 = smov (!%p173_p9), [#allocation2]  }
  0x15   : > { %812 = vmatpush3.bf16.msra.mxu0 (!%p173_p9), %v902_v1  ;;  %854 = vmatpush3.bf16.msra.mxu1 (!%p173_p9), %v902_v1  ;;  %s909_s13 = sshll.u32 (!%p173_p9), %s1001_s12, 4  ;;  %s910_s13 = int_to_ptr.vmem [resolvable:$false] %s909_s13 }
  0x16   : > { %813 = vmatprep.subr.bf16.mxu0 (!%p173_p9), %v903_v2  ;;  %851 = vmatprep.subr.bf16.mxu1 (!%p173_p9), %v903_v2  ;;  %s911_s14 = scalar_lea.vmem (!%p173_p9), %s910_s13, 32  ;;  %p912_p0 = scmp.lt.s32.totalorder (!%p173_p9), %s1240_s28, %s910_s13 }
  0x17   : > { %s1324_s29 = smov (!%p202_p10, %s762_s29), 127 }
  0x18   : > { %s763_s8 = sshll.u32 %s1324_s29, 3  ;;  %s200_s29 = scalar_lea.vmem [#allocation4], %s1228_s22 }
  0x19   : > { %s1089_s11 = scalar_lea.vmem %s1312_s0, %s763_s8  ;;  %814 = vmatpush3.bf16.msra.mxu0 %v903_v2  ;;  %855 = vmatpush3.bf16.msra.mxu1 %v903_v2  ;;  %s675_s30 = sshll.u32 %s200_s29, 4  ;;  %s1247_s30 = int_to_ptr.vmem [resolvable:$true] %s675_s30 }
  0x1a   : > { %v208_v3 = vld [vmem:[%s1089_s11] sm:$0xff]  ;;  %v209_v4 = vld [vmem:[%s1089_s11 + $0x8] sm:$0xff]  ;;  %v210_v7 = vld [vmem:[%s1089_s11 + $0x10] sm:$0xff]  ;;  %815 = vmatprep.subr.bf16.mxu0 %v904_v5  ;;  %852 = vmatprep.subr.bf16.mxu1 %v904_v5 }
  0x1b   : > { %v240_v6 = vpack.c.bf16 %v209_v4, %v208_v3  ;;  %v211_v8 = vld [vmem:[%s1089_s11 + $0x18] sm:$0xff]  ;;  %v212_v9 = vld [vmem:[%s1089_s11 + $0x20] sm:$0xff]  ;;  %v213_v10 = vld [vmem:[%s1089_s11 + $0x28] sm:$0xff] }
  0x1c   : > { %v224_v11 = vld [vmem:[%s1089_s11 + $0x80] sm:$0xff]  ;;  %v225_v12 = vld [vmem:[%s1089_s11 + $0x88] sm:$0xff]  ;;  %v226_v14 = vld [vmem:[%s1089_s11 + $0x90] sm:$0xff]  ;;  %v241_v17 = vpack.c.bf16 %v211_v8, %v210_v7  ;;  %v242_v20 = vpack.c.bf16 %v213_v10, %v212_v9 }
  0x1d   : > { %817 = vmatprep.mubr.msk.bf16.mxu0 %vm295_vm0, %v240_v6  ;;  %v248_v13 = vpack.c.bf16 %v225_v12, %v224_v11  ;;  %v227_v15 = vld [vmem:[%s1089_s11 + $0x98] sm:$0xff]  ;;  %v228_v16 = vld [vmem:[%s1089_s11 + $0xa0] sm:$0xff]  ;;  %v229_v19 = vld [vmem:[%s1089_s11 + $0xa8] sm:$0xff]  ;;  %816 = vmatpush3.bf16.msra.mxu0 %v904_v5 }
  0x1e   : > { %v249_v18 = vpack.c.bf16 %v227_v15, %v226_v14  ;;  %856 = vmatpush3.bf16.msra.mxu1 %v904_v5  ;;  %v250_v21 = vpack.c.bf16 %v229_v19, %v228_v16  ;;  %v214_v22 = vld [vmem:[%s1089_s11 + $0x30] sm:$0xff]  ;;  %v215_v23 = vld [vmem:[%s1089_s11 + $0x38] sm:$0xff]  ;;  %v216_v24 = vld [vmem:[%s1089_s11 + $0x40] sm:$0xff] }
  0x1f   : > { %833 = vmatprep.mubr.msk.bf16.mxu1 %vm295_vm0, %v248_v13  ;;  %v230_v25 = vld [vmem:[%s1089_s11 + $0xb0] sm:$0xff]  ;;  %v231_v26 = vld [vmem:[%s1089_s11 + $0xb8] sm:$0xff]  ;;  %v217_v27 = vld [vmem:[%s1089_s11 + $0x48] sm:$0xff]  ;;  %v243_v30 = vpack.c.bf16 %v215_v23, %v214_v22 }
  0x20   : > { %818 = vmatmul.mubr.msk.bf16.vlgmr.msra.gmra.mrb[0].mxu0 %vm295_vm0, %v241_v17  ;;  %v232_v28 = vld [vmem:[%s1089_s11 + $0xc0] sm:$0xff]  ;;  %v233_v29 = vld [vmem:[%s1089_s11 + $0xc8] sm:$0xff]  ;;  %v251_v31 = vpack.c.bf16 %v231_v26, %v230_v25  ;;  %v244_v32 = vpack.c.bf16 %v217_v27, %v216_v24  ;;  %v218_v34 = vld [vmem:[%s1089_s11 + $0x50] sm:$0xff] }
  0x21   : > { %834 = vmatmul.mubr.msk.bf16.vlgmr.msra.gmra.mrb[0].mxu1 %vm295_vm0, %v249_v18  ;;  %821 = vmatprep.mubr.msk.bf16.mxu0 %vm295_vm0, %v242_v20  ;;  %v252_v33 = vpack.c.bf16 %v233_v29, %v232_v28  ;;  %v219_v35 = vld [vmem:[%s1089_s11 + $0x58] sm:$0xff]  ;;  %v220_v36 = vld [vmem:[%s1089_s11 + $0x60] sm:$0xff]  ;;  %v234_v37 = vld [vmem:[%s1089_s11 + $0xd0] sm:$0xff] }
  0x22   : > { %837 = vmatprep.mubr.msk.bf16.mxu1 %vm295_vm0, %v250_v21  ;;  %v235_v38 = vld [vmem:[%s1089_s11 + $0xd8] sm:$0xff]  ;;  %v221_v39 = vld [vmem:[%s1089_s11 + $0x68] sm:$0xff]  ;;  %v236_v40 = vld [vmem:[%s1089_s11 + $0xe0] sm:$0xff]  ;;  %v245_v42 = vpack.c.bf16 %v219_v35, %v218_v34 }
  0x23   : > { %v237_v41 = vld [vmem:[%s1089_s11 + $0xe8] sm:$0xff]  ;;  %v253_v43 = vpack.c.bf16 %v235_v38, %v234_v37  ;;  %v246_v44 = vpack.c.bf16 %v221_v39, %v220_v36  ;;  %v222_v46 = vld [vmem:[%s1089_s11 + $0x70] sm:$0xff]  ;;  %v223_v47 = vld [vmem:[%s1089_s11 + $0x78] sm:$0xff] }
  0x24   : > { %v254_v45 = vpack.c.bf16 %v237_v41, %v236_v40  ;;  %v238_v48 = vld [vmem:[%s1089_s11 + $0xf0] sm:$0xff]  ;;  %v239_v49 = vld [vmem:[%s1089_s11 + $0xf8] sm:$0xff]  ;;  %v247_v50 = vpack.c.bf16 %v223_v47, %v222_v46  ;;  %s905_s11 = scalar_lea.vmem %s1240_s28, 16 }
  0x25   : > { %v255_v51 = vpack.c.bf16 %v239_v49, %v238_v48  ;;  %p906_p11 = scmp.ne.s32.totalorder %s1240_s28, %s905_s11  ;;  %p913_p1 = scmp.lt.s32.totalorder %s911_s14, %s905_s11 }
  0x27   : > { %p907_p12 = pnand %p906_p11, %p1066_p5  ;;  %p914_p2 = por %p913_p1, %p912_p0 }
  0x28   : > { %822 = vmatmul.mubr.msk.bf16.gmra.mrb[4].mxu0 %vm295_vm0, %v243_v30 }
  0x29   : > { %838 = vmatmul.mubr.msk.bf16.gmra.mrb[4].mxu1 %vm295_vm0, %v251_v31  ;;  %825 = vmatprep.mubr.msk.bf16.mxu0 %vm295_vm0, %v244_v32  ;;  %p908_p13 = pneg %p907_p12 }
  0x2a   : > { %841 = vmatprep.mubr.msk.bf16.mxu1 %vm295_vm0, %v252_v33 }
  0x2b   : > { %p915_p3 = pnand %p914_p2, %p908_p13 }
  0x30   : > { %826 = vmatmul.mubr.msk.bf16.gmra.mrb[8].mxu0 %vm295_vm0, %v245_v42 }
  0x31   : > { %842 = vmatmul.mubr.msk.bf16.gmra.mrb[8].mxu1 %vm295_vm0, %v253_v43  ;;  %829 = vmatprep.mubr.msk.bf16.mxu0 %vm295_vm0, %v246_v44 }
  0x32   : > { %845 = vmatprep.mubr.msk.bf16.mxu1 %vm295_vm0, %v254_v45 }
  0x38   : > { %830 = vmatmul.mubr.msk.bf16.gmra.mrb[12].mxu0 %vm295_vm0, %v247_v50 }
  0x39   : > { %846 = vmatmul.mubr.msk.bf16.gmra.mrb[12].mxu1 %vm295_vm0, %v255_v51 }
  0xf3   : > { %v819_v53 = vpop.f32.mrb[0].mxu0 }
  0xf4   : > { %v1147_v54 = vpop.f32.mrb[0].mxu1  ;;  %v378_v55 = vpop.f32.mrb[1].mxu0  ;;  %v387_v57 = vadd.f32 %v819_v53, %v1145_v52 }
  0xf5   : > { %v1149_v56 = vpop.f32.mrb[1].mxu1  ;;  %v379_v58 = vadd.f32 %v1145_v52, %v378_v55  ;;  %v820_v59 = vpop.f32.mrb[2].mxu0 }
  0xf6   : > { %v1153_v60 = vpop.f32.mrb[2].mxu1  ;;  %v390_v61 = vadd.f32 %v820_v59, %v1145_v52  ;;  %v381_v62 = vpop.f32.mrb[3].mxu0  ;;  %v507_v2 = vmax.f32 %v387_v57, 0.0 }
  0xf7   : > { %v1156_v63 = vpop.f32.mrb[3].mxu1  ;;  %v505_v0 = vmax.f32 %v379_v58, 0.0  ;;  %v382_v1 = vadd.f32 %v1145_v52, %v381_v62 }
  0xf8   : > { %v508_v4 = vmax.f32 %v390_v61, 0.0  ;;  %v577_v13 = vmul.f32 %v507_v2, %v507_v2 }
  0xf9   : > { %v506_v3 = vmax.f32 %v382_v1, 0.0  ;;  %v575_v5 = vmul.f32 %v505_v0, %v505_v0 }
  0xfa   : > { %v578_v19 = vmul.f32 %v508_v4, %v508_v4 }
  0xfb   : > { %v537_v6 = vadd.f32 %v506_v3, %v505_v0  ;;  %v576_v7 = vmul.f32 %v506_v3, %v506_v3  ;;  %v823_v8 = vpop.f32.mrb[4].mxu0 }
  0xfc   : > { %v1159_v9 = vpop.f32.mrb[4].mxu1  ;;  %v403_v10 = vadd.f32 %v823_v8, %v1145_v52  ;;  %v394_v11 = vpop.f32.mrb[5].mxu0 }
  0xfd   : > { %v1162_v12 = vpop.f32.mrb[5].mxu1  ;;  %v538_v14 = vadd.f32 %v537_v6, %v507_v2  ;;  %v607_v15 = vadd.f32 %v576_v7, %v575_v5  ;;  %v395_v16 = vadd.f32 %v1145_v52, %v394_v11  ;;  %v824_v17 = vpop.f32.mrb[6].mxu0 }
  0xfe   : > { %v1165_v18 = vpop.f32.mrb[6].mxu1  ;;  %v406_v20 = vadd.f32 %v824_v17, %v1145_v52  ;;  %v397_v21 = vpop.f32.mrb[7].mxu0  ;;  %v511_v27 = vmax.f32 %v403_v10, 0.0 }
  0xff   : > { %v1168_v22 = vpop.f32.mrb[7].mxu1  ;;  %v608_v23 = vadd.f32 %v607_v15, %v577_v13  ;;  %v509_v24 = vmax.f32 %v395_v16, 0.0  ;;  %v539_v25 = vadd.f32 %v538_v14, %v508_v4  ;;  %v398_v26 = vadd.f32 %v1145_v52, %v397_v21 }
 0x100   : > { %v512_v32 = vmax.f32 %v406_v20, 0.0  ;;  %v581_v41 = vmul.f32 %v511_v27, %v511_v27 }
 0x101   : > { %v540_v28 = vadd.f32 %v539_v25, %v509_v24  ;;  %v579_v29 = vmul.f32 %v509_v24, %v509_v24  ;;  %v609_v30 = vadd.f32 %v608_v23, %v578_v19  ;;  %v510_v31 = vmax.f32 %v398_v26, 0.0 }
 0x102   : > { %v582_v47 = vmul.f32 %v512_v32, %v512_v32  ;;  %v443_v23 = vadd.f32 %v1145_v52, %v1149_v56 }
 0x103   : > { %v610_v33 = vadd.f32 %v609_v30, %v579_v29  ;;  %v541_v34 = vadd.f32 %v540_v28, %v510_v31  ;;  %v580_v35 = vmul.f32 %v510_v31, %v510_v31  ;;  %v827_v36 = vpop.f32.mrb[8].mxu0 }
 0x104   : > { %v1171_v37 = vpop.f32.mrb[8].mxu1  ;;  %v419_v38 = vadd.f32 %v827_v36, %v1145_v52  ;;  %v410_v39 = vpop.f32.mrb[9].mxu0 }
 0x105   : > { %v1174_v40 = vpop.f32.mrb[9].mxu1  ;;  %v542_v42 = vadd.f32 %v541_v34, %v511_v27  ;;  %v611_v43 = vadd.f32 %v610_v33, %v580_v35  ;;  %v411_v44 = vadd.f32 %v1145_v52, %v410_v39  ;;  %v828_v45 = vpop.f32.mrb[10].mxu0  ;;  %v521_v34 = vmax.f32 %v443_v23, 0.0 }
 0x106   : > { %v1177_v46 = vpop.f32.mrb[10].mxu1  ;;  %v422_v48 = vadd.f32 %v828_v45, %v1145_v52  ;;  %v413_v49 = vpop.f32.mrb[11].mxu0  ;;  %v515_v58 = vmax.f32 %v419_v38, 0.0  ;;  %v446_v35 = vadd.f32 %v1145_v52, %v1156_v63  ;;  %v459_v63 = vadd.f32 %v1145_v52, %v1162_v12 }
 0x107   : > { %v1180_v50 = vpop.f32.mrb[11].mxu1  ;;  %v612_v51 = vadd.f32 %v611_v43, %v581_v41  ;;  %v513_v53 = vmax.f32 %v411_v44, 0.0  ;;  %v543_v55 = vadd.f32 %v542_v42, %v512_v32  ;;  %v414_v57 = vadd.f32 %v1145_v52, %v413_v49 }
 0x108   : > { %v516_v1 = vmax.f32 %v422_v48, 0.0  ;;  %v585_v11 = vmul.f32 %v515_v58, %v515_v58  ;;  %v451_v44 = vadd.f32 %v1147_v54, %v1145_v52  ;;  %v591_v45 = vmul.f32 %v521_v34, %v521_v34 }
 0x109   : > { %v544_v59 = vadd.f32 %v543_v55, %v513_v53  ;;  %v583_v61 = vmul.f32 %v513_v53, %v513_v53  ;;  %v613_v62 = vadd.f32 %v612_v51, %v582_v47  ;;  %v514_v0 = vmax.f32 %v414_v57, 0.0 }
 0x10a   : > { %v586_v19 = vmul.f32 %v516_v1, %v516_v1  ;;  %v454_v47 = vadd.f32 %v1153_v60, %v1145_v52  ;;  %v522_v48 = vmax.f32 %v446_v35, 0.0  ;;  %v523_v55 = vmax.f32 %v451_v44, 0.0 }
 0x10b   : > { %v614_v2 = vadd.f32 %v613_v62, %v583_v61  ;;  %v545_v3 = vadd.f32 %v544_v59, %v514_v0  ;;  %v584_v4 = vmul.f32 %v514_v0, %v514_v0  ;;  %v831_v5 = vpop.f32.mrb[12].mxu0  ;;  %v462_v61 = vadd.f32 %v1145_v52, %v1168_v22 }
 0x10c   : > { %v1183_v6 = vpop.f32.mrb[12].mxu1  ;;  %v435_v7 = vadd.f32 %v831_v5, %v1145_v52  ;;  %v426_v8 = vpop.f32.mrb[13].mxu0  ;;  %v524_v59 = vmax.f32 %v454_v47, 0.0  ;;  %v592_v0 = vmul.f32 %v522_v48, %v522_v48  ;;  %v470_v12 = vadd.f32 %v1165_v18, %v1145_v52 }
 0x10d   : > { %v1186_v10 = vpop.f32.mrb[13].mxu1  ;;  %v546_v13 = vadd.f32 %v545_v3, %v515_v58  ;;  %v615_v14 = vadd.f32 %v614_v2, %v584_v4  ;;  %v427_v15 = vadd.f32 %v1145_v52, %v426_v8  ;;  %v832_v16 = vpop.f32.mrb[14].mxu0  ;;  %v593_v2 = vmul.f32 %v523_v55, %v523_v55 }
 0x10e   : > { %v1189_v17 = vpop.f32.mrb[14].mxu1  ;;  %v438_v20 = vadd.f32 %v832_v16, %v1145_v52  ;;  %v429_v21 = vpop.f32.mrb[15].mxu0  ;;  %v519_v29 = vmax.f32 %v435_v7, 0.0  ;;  %v467_v4 = vadd.f32 %v1159_v9, %v1145_v52  ;;  %v594_v5 = vmul.f32 %v524_v59, %v524_v59 }
 0x10f   : > { %v1194_v24 = vpop.f32.mrb[15].mxu1  ;;  %v616_v25 = vadd.f32 %v615_v14, %v585_v11  ;;  %v517_v26 = vmax.f32 %v427_v15, 0.0  ;;  %v547_v27 = vadd.f32 %v546_v13, %v516_v1  ;;  %v430_v28 = vadd.f32 %v1145_v52, %v429_v21 }
 0x110   : > { %v520_v38 = vmax.f32 %v438_v20, 0.0  ;;  %v589_v41 = vmul.f32 %v519_v29, %v519_v29  ;;  %v525_v1 = vmax.f32 %v459_v63, 0.0  ;;  %v526_v7 = vmax.f32 %v462_v61, 0.0 }
 0x111   : > { %v548_v30 = vadd.f32 %v547_v27, %v517_v26  ;;  %v587_v31 = vmul.f32 %v517_v26, %v517_v26  ;;  %v617_v32 = vadd.f32 %v616_v25, %v586_v19  ;;  %v518_v33 = vmax.f32 %v430_v28, 0.0 }
 0x112   : > { %v590_v49 = vmul.f32 %v520_v38, %v520_v38  ;;  %v595_v13 = vmul.f32 %v525_v1, %v525_v1  ;;  %v475_v22 = vadd.f32 %v1145_v52, %v1174_v40  ;;  %v527_v14 = vmax.f32 %v467_v4, 0.0 }
 0x113   : > { %v618_v36 = vadd.f32 %v617_v32, %v587_v31  ;;  %v549_v39 = vadd.f32 %v548_v30, %v518_v33  ;;  %v588_v56 = vmul.f32 %v518_v33, %v518_v33  ;;  %v528_v19 = vmax.f32 %v470_v12, 0.0 }
 0x114   : > { %v596_v20 = vmul.f32 %v526_v7, %v526_v7  ;;  %v529_v25 = vmax.f32 %v475_v22, 0.0  ;;  %v478_v9 = vadd.f32 %v1145_v52, %v1180_v50  ;;  %v597_v26 = vmul.f32 %v527_v14, %v527_v14 }
 0x115   : > { %v550_v42 = vadd.f32 %v549_v39, %v519_v29  ;;  %v619_v43 = vadd.f32 %v618_v36, %v588_v56  ;;  %v483_v28 = vadd.f32 %v1171_v37, %v1145_v52  ;;  %v598_v29 = vmul.f32 %v528_v19, %v528_v19 }
 0x116   : > { %v486_v40 = vadd.f32 %v1177_v46, %v1145_v52  ;;  %v491_v30 = vadd.f32 %v1145_v52, %v1186_v10  ;;  %v599_v33 = vmul.f32 %v529_v25, %v529_v25  ;;  %v494_v37 = vadd.f32 %v1145_v52, %v1194_v24 }
 0x117   : > { %v620_v51 = vadd.f32 %v619_v43, %v589_v41  ;;  %v551_v53 = vadd.f32 %v550_v42, %v520_v38  ;;  %v531_v35 = vmax.f32 %v483_v28, 0.0  ;;  %v499_v10 = vadd.f32 %v1183_v6, %v1145_v52 }
 0x118   : > { %v532_v38 = vmax.f32 %v486_v40, 0.0  ;;  %v533_v39 = vmax.f32 %v491_v30, 0.0 }
 0x119   : > { %v552_v57 = vadd.f32 %v551_v53, %v521_v34  ;;  %v621_v58 = vadd.f32 %v620_v51, %v590_v49  ;;  %v530_v34 = vmax.f32 %v478_v9, 0.0  ;;  %v601_v43 = vmul.f32 %v531_v35, %v531_v35 }
 0x11a   : > { %v603_v47 = vmul.f32 %v533_v39, %v533_v39  ;;  %v502_v51 = vadd.f32 %v1189_v17, %v1145_v52  ;;  %v534_v53 = vmax.f32 %v494_v37, 0.0  ;;  %v535_v63 = vmax.f32 %v499_v10, 0.0 }
 0x11b   : > { %v622_v62 = vadd.f32 %v621_v58, %v591_v45  ;;  %v553_v54 = vadd.f32 %v552_v57, %v522_v48  ;;  %v600_v42 = vmul.f32 %v530_v34, %v530_v34  ;;  %v602_v45 = vmul.f32 %v532_v38, %v532_v38 }
 0x11c   : > { %v536_v24 = vmax.f32 %v502_v51, 0.0  ;;  %v604_v61 = vmul.f32 %v534_v53, %v534_v53 }
 0x11d   : > { %v554_v60 = vadd.f32 %v553_v54, %v523_v55  ;;  %v623_v3 = vadd.f32 %v622_v62, %v592_v0  ;;  %v605_v62 = vmul.f32 %v535_v63, %v535_v63 }
 0x11e   : > { %v606_v0 = vmul.f32 %v536_v24, %v536_v24 }
 0x11f   : > { %v624_v8 = vadd.f32 %v623_v3, %v593_v2  ;;  %v555_v11 = vadd.f32 %v554_v60, %v524_v59 }
 0x121   : > { %v556_v15 = vadd.f32 %v555_v11, %v525_v1  ;;  %v625_v16 = vadd.f32 %v624_v8, %v594_v5 }
 0x123   : > { %v626_v21 = vadd.f32 %v625_v16, %v595_v13  ;;  %v557_v23 = vadd.f32 %v556_v15, %v526_v7 }
 0x125   : > { %v558_v18 = vadd.f32 %v557_v23, %v527_v14  ;;  %v627_v27 = vadd.f32 %v626_v21, %v596_v20 }
 0x127   : > { %v628_v31 = vadd.f32 %v627_v27, %v597_v26  ;;  %v559_v32 = vadd.f32 %v558_v18, %v528_v19 }
 0x129   : > { %v560_v36 = vadd.f32 %v559_v32, %v529_v25  ;;  %v629_v50 = vadd.f32 %v628_v31, %v598_v29 }
 0x12b   : > { %v630_v56 = vadd.f32 %v629_v50, %v599_v33  ;;  %v561_v41 = vadd.f32 %v560_v36, %v530_v34 }
 0x12d   : > { %v562_v46 = vadd.f32 %v561_v41, %v531_v35  ;;  %v631_v44 = vadd.f32 %v630_v56, %v600_v42 }
 0x12f   : > { %v632_v48 = vadd.f32 %v631_v44, %v601_v43  ;;  %v563_v49 = vadd.f32 %v562_v46, %v532_v38 }
 0x131   : > { %v564_v55 = vadd.f32 %v563_v49, %v533_v39  ;;  %v633_v57 = vadd.f32 %v632_v48, %v602_v45 }
 0x133   : > { %v634_v58 = vadd.f32 %v633_v57, %v603_v47  ;;  %v565_v59 = vadd.f32 %v564_v55, %v534_v53 }
 0x135   : > { %v566_v54 = vadd.f32 %v565_v59, %v535_v63  ;;  %v635_v6 = vadd.f32 %v634_v58, %v604_v61 }
 0x137   : > { %v567_v1 = vadd.f32 %v566_v54, %v536_v24  ;;  %v636_v2 = vadd.f32 %v635_v6, %v605_v62 }
 0x139   : > { %v568_v60 = vrot.slane %v567_v1, 4  ;;  %v637_v3 = vadd.f32 %v636_v2, %v606_v0 }
 0x13b   : > { %v569_v52 = vadd.f32 %v568_v60, %v567_v1  ;;  %v638_v17 = vrot.slane %v637_v3, 4 }
 0x13d   : > { %v570_v4 = vrot.slane %v569_v52, 2  ;;  %v639_v5 = vadd.f32 %v638_v17, %v637_v3 }
 0x13f   : > { %v571_v12 = vadd.f32 %v570_v4, %v569_v52  ;;  %v640_v7 = vrot.slane %v639_v5, 2 }
 0x141   : > { %v572_v8 = vrot.slane %v571_v12, 1  ;;  %v641_v11 = vadd.f32 %v640_v7, %v639_v5 }
 0x143   : > { %v573_v13 = vadd.f32 %v572_v8, %v571_v12  ;;  %v642_v22 = vrot.slane %v641_v11, 1 }
 0x145   : > { %574 = vst [vmem:[%s194_s27] sm:$0x1] %v573_v13  ;;  %v643_v14 = vadd.f32 %v642_v22, %v641_v11 }
 0x146   : > { %918 = shalt.err (!%p915_p3)
}
 0x147   : > { %s919_s20 = scalar_lea.hbm %s1238_s7, 16  ;;  %s923_s5 = scalar_lea.hbm %s1315_s3, 64 }
 0x148   : > { %p920_p4 = scmp.ne.s32.totalorder %s1238_s7, %s919_s20  ;;  %p924_p9 = scmp.lt.u32.totalorder %s1238_s7, %s1315_s3 }
 0x149   : > { %p925_p10 = scmp.lt.u32.totalorder %s923_s5, %s919_s20  ;;  %p927_p12 = scmp.lt.u32.totalorder %s919_s20, %s1238_s7 }
 0x14a   : > { %p921_p7 = pnand %p920_p4, %p1066_p5 }
 0x14b   : > { %p926_p11 = por %p925_p10, %p924_p9 }
 0x14c   : > { %p922_p8 = pneg %p921_p7 }
 0x14d   : > { %p928_p13 = por %p927_p12, %p926_p11 }
 0x14f   : > { %p929_p0 = pnand %p928_p13, %p922_p8 }
 0x151   : > { %932 = shalt.err (!%p929_p0)
}
 0x152   : > { %857 = dma.vmem_to_hbm [thread:$0]  (%p1066_p5), %s1240_s28, 16, %s1238_s7, %s646_s10   ;;  %644 = vst [vmem:[%s200_s29] sm:$0x1] %v643_v14 }
 0x153   : > { %s650_s8 = scalar_lea.sflag [#allocation5], %s1228_s22  ;;  %s933_s11 = scalar_lea.vmem %s1247_s30, 16 }
 0x154   : > { %p934_p1 = scmp.ne.s32.totalorder %s1247_s30, %s933_s11  ;;  %s1002_s12 = smov [#allocation4]  }
 0x155   : > { %s937_s13 = sshll.u32 %s1002_s12, 4  ;;  %s938_s13 = int_to_ptr.vmem [resolvable:$false] %s937_s13 }
 0x156   : > { %p935_p2 = pnand %p934_p1, %p1066_p5  ;;  %s939_s14 = scalar_lea.vmem %s938_s13, 32 }
 0x157   : > { %p940_p4 = scmp.lt.s32.totalorder %s1247_s30, %s938_s13  ;;  %p941_p7 = scmp.lt.s32.totalorder %s939_s14, %s933_s11 }
 0x158   : > { %p936_p3 = pneg %p935_p2 }
 0x159   : > { %p942_p8 = por %p941_p7, %p940_p4 }
 0x15b   : > { %p943_p9 = pnand %p942_p8, %p936_p3 }
 0x15d   : > { %946 = shalt.err (!%p943_p9)
}
 0x15e   : > { %s947_s22 = scalar_lea.hbm %s1245_s9, 16  ;;  %s951_s7 = scalar_lea.hbm %s1316_s4, 64 }
 0x15f   : > { %p948_p10 = scmp.ne.s32.totalorder %s1245_s9, %s947_s22  ;;  %p952_p13 = scmp.lt.u32.totalorder %s1245_s9, %s1316_s4 }
 0x160   : > { %p953_p0 = scmp.lt.u32.totalorder %s951_s7, %s947_s22  ;;  %p955_p2 = scmp.lt.u32.totalorder %s947_s22, %s1245_s9 }
 0x161   : > { %p949_p11 = pnand %p948_p10, %p1066_p5 }
 0x162   : > { %p954_p1 = por %p953_p0, %p952_p13 }
 0x163   : > { %p950_p12 = pneg %p949_p11 }
 0x164   : > { %p956_p3 = por %p955_p2, %p954_p1 }
 0x166   : > { %p957_p4 = pnand %p956_p3, %p950_p12 }
 0x168   : > { %960 = shalt.err (!%p957_p4)
}
 0x169   : > { %858 = dma.vmem_to_hbm [thread:$0]  (%p1066_p5), %s1247_s30, 16, %s1245_s9, %s650_s8  }
 0x16a PF: > { %p868_p7 = scmp.ge.s32.totalorder %s999_s18, 2  ;;  %s687_s23 = sand.u32 1, %s987_s15  }
 0x16b   : > { %s688_s27 = scalar_lea.sflag [#allocation3], %s687_s23 }
 0x16c   : > { %p862_p8 = pnand %p868_p7, %p1070_p6 }
 0x16e   : > { %978 = dma.done.wait (!%p862_p8), %s688_s27, 16  }
 0x16f   : > { %980 = vsyncadd (!%p862_p8), %s688_s27, 4294967280  ;;  %s696_s5 = scalar_lea.sflag [#allocation5], %s687_s23 }
 0x170   : > { %982 = dma.done.wait (!%p862_p8), %s696_s5, 16  }
 0x171   : > { %984 = vsyncadd (!%p862_p8), %s696_s5, 4294967280  ;;  %p18_p5 = scmp.ge.s32.totalorder %s1053_s21, 6   ;;  %s1319_s15 = smov %s991_s16 }
 0x172   : > { %s1320_s16 = smov %s995_s17  ;;  %s1321_s17 = smov %s1064_s24 }
 0x173   : > { %s1322_s18 = smov %s1053_s21  ;;  %20 = sbr.rel (!%p18_p5) target bundleno = 5 (0x5), region = 84 }
 0x17a   :  { %700 = vsyncpa [#allocation3], 1 }
 0x17b   :  { %702 = vsyncpa [#allocation3 + $0x1], 1 }
 0x17c   :  { %703 = vsyncpa [#allocation5], 1 }
 0x17d   :  { %705 = vsyncpa [#allocation5 + $0x1], 1 }

</bundles_post_ra>
